<compile_context>
chip_gen: v6e
topology: v6e:2x2x1
jax: 0.10.0
libtpu: 0.0.40
codegen_flags: <defaults>
</compile_context>

<pallas_src>
import functools

import jax
import jax.numpy as jnp
from jax.experimental import pallas as pl
from jax.experimental.pallas import tpu as pltpu


def _round_up(a, m):
    return ((a + m - 1) // m) * m


def _expertise_kernel(x_ref, v_ref, w_ref, b_ref, res_ref, out_ref, acc_ref,
                      *, n_total, tn):
    # x_ref: (TB, TN, D)  v_ref: (TB, TN)  w_ref: (1, D) VMEM  b_ref: (1,) SMEM
    # res_ref: (TB, 1)    out_ref: (TB, TN)  acc_ref: (TB, 1) f32 VMEM scratch
    n = pl.program_id(1)

    @pl.when(n == 0)
    def _():
        acc_ref[...] = jnp.zeros_like(acc_ref)

    x = x_ref[...]                                # native dtype (bf16 stays bf16)
    w = w_ref[...].reshape(1, 1, -1)              # (1, 1, D), D on lanes
    b = b_ref[0].astype(jnp.float32)              # scalar from SMEM

    # Linear(dim, 1): native-dtype VPU multiply + lane (XLU) reduction with an
    # f32 accumulator over D.  Avoids a 1-column MXU matmul and avoids an
    # explicit f32 pre-widen of the x block.
    out = jnp.sum(x * w, axis=-1, dtype=jnp.float32) + b      # (TB, TN) f32
    # TODO(synk): audit the sublane->lane relayout of this reduce result on the
    # `out` store path (perf-review item 8); its traffic is D x smaller than
    # the x stream, so it is accepted here.
    out_ref[...] = out.astype(out_ref.dtype)

    v = v_ref[...].astype(jnp.float32)                        # (TB, TN)
    contrib = out * v
    if n_total % tn != 0:
        # Mask the padded tail of the last N tile so padded-region garbage in
        # x / v cannot leak into the reduction over N.
        col = jax.lax.broadcasted_iota(jnp.int32, contrib.shape, 1)
        contrib = jnp.where(n * tn + col < n_total, contrib, 0.0)
    acc_ref[...] += jnp.sum(contrib, axis=1, keepdims=True)   # (TB, 1) f32

    @pl.when(n == pl.num_programs(1) - 1)
    def _():
        # result = sum_n(out * v); written once per batch tile (B*4 bytes per
        # kernel in total -> masked store cost is noise; lane-major would
        # constrain TB to multiples of 128 for no measurable gain).
        res_ref[...] = acc_ref[...].astype(res_ref.dtype)


def _choose_tiles(B, N, D, x_item, v_item, out_item, block_budget):
    """Pick (TB, TN) so the double-buffered block footprint (plus the widened
    D-reduction intermediate) fits `block_budget`, while leaving multiple grid
    steps for pipelining / v7x megacore when the problem is big enough."""
    # Bytes attributable to one (batch, n) element:
    #   double-buffered x / v / out blocks + single-buffered native + f32
    #   intermediates of the D-reduction.
    per_bn = 2 * (D * x_item + v_item + out_item) + D * (x_item + 4)
    max_bn = max(block_budget // per_bn, 64)      # (TB*TN) elements we may hold

    # N tile: keep the full N extent when an 8-row batch tile still fits
    # (no tail masking, maximally lane-dense `out` stores); otherwise a
    # lane-dense multiple of 128.
    if 8 * N <= max_bn:
        tn = N
    else:
        tn = max(((max_bn // 8) // 128) * 128, 128)
        if tn >= N:
            tn = N

    # Batch tile: sublane-aligned, within budget, aiming for ~8 batch grid
    # steps (pipelining depth + v7x megacore sharding) when B is large enough.
    tb_fit = max(((max_bn // tn) // 8) * 8, 8)
    if B <= 8:
        tb = B                                    # tiny batch: one full block
    else:
        tb_target = _round_up(pl.cdiv(B, 8), 8)
        tb = max(min(tb_target, tb_fit, _round_up(B, 8)), 8)
    return tb, tn


def full_expertise_forward(x, v, weight, bias):
    """x: (B, N, D), v: (B, N, 1), weight: (1, D) [torch layout], bias: (1,).

    Returns (result, out) with result (B, 1) and out (B, N, 1), matching
    FullExpertiseModelGreyBox.forward with dropout p=0 (identity).
    """
    B, N, D = x.shape
    v2d = v.reshape(B, N)                         # lane-dense, drop trailing 1
    w2d = weight.reshape(1, D)                    # torch layout, D on lanes
    b1d = bias.reshape(1)

    out_dtype = x.dtype                           # linear output follows input dtype
    res_dtype = jnp.promote_types(out_dtype, v.dtype)
    out_item = jnp.dtype(out_dtype).itemsize

    # VMEM-budgeted tiling per TPU generation (128 MiB v5e/v6e, 64 MiB v7x).
    try:
        vmem_cap = int(pltpu.get_tpu_info().vmem_capacity_bytes)
    except Exception:
        vmem_cap = 64 * 1024 * 1024               # conservative (v7x-sized) fallback
    vmem_limit = min(int(vmem_cap * 0.75), 100 * 1024 * 1024)
    block_budget = int(vmem_limit * 0.6)

    TB, TN = _choose_tiles(B, N, D, x.dtype.itemsize, v2d.dtype.itemsize,
                           out_item, block_budget)
    grid = (pl.cdiv(B, TB), pl.cdiv(N, TN))       # reduction (N) axis last

    kernel = functools.partial(_expertise_kernel, n_total=N, tn=TN)

    x_spec = pl.BlockSpec((TB, TN, D), lambda i, n: (i, n, 0))
    v_spec = pl.BlockSpec((TB, TN), lambda i, n: (i, n))
    w_spec = pl.BlockSpec((1, D), lambda i, n: (0, 0))
    b_spec = pl.BlockSpec(memory_space=pltpu.MemorySpace.SMEM)
    res_spec = pl.BlockSpec((TB, 1), lambda i, n: (i, 0))    # resident across n
    out_spec = pl.BlockSpec((TB, TN), lambda i, n: (i, n))   # lane-dense stores

    bytes_accessed = (x.size * x.dtype.itemsize
                      + v2d.size * v2d.dtype.itemsize
                      + w2d.size * w2d.dtype.itemsize
                      + b1d.size * b1d.dtype.itemsize
                      + B * N * out_item
                      + B * jnp.dtype(res_dtype).itemsize)
    cost = pl.CostEstimate(flops=2 * B * N * D + 3 * B * N,
                           transcendentals=0,
                           bytes_accessed=bytes_accessed)

    result, out2d = pl.pallas_call(
        kernel,
        out_shape=(
            jax.ShapeDtypeStruct((B, 1), res_dtype),         # result
            jax.ShapeDtypeStruct((B, N), out_dtype),          # out (lane-dense)
        ),
        grid=grid,
        in_specs=[x_spec, v_spec, w_spec, b_spec],
        out_specs=(res_spec, out_spec),
        scratch_shapes=[pltpu.VMEM((TB, 1), jnp.float32)],
        compiler_params=pltpu.CompilerParams(
            dimension_semantics=("parallel", "arbitrary"),    # v7x megacore on batch
            vmem_limit_bytes=vmem_limit),
        cost_estimate=cost,
    )(x, v2d, w2d, b1d)

    return result, out2d.reshape(B, N, 1)                     # restore torch shape


def reference_forward(x, v, weight, bias):
    # Pure-JAX reference mirroring the PyTorch module (dropout p=0 == identity).
    out = jnp.einsum("bnd,od->bno", x, weight) + bias          # (B, N, 1)
    result = jnp.sum(out * v, axis=1)                          # (B, 1)
    return result, out


if __name__ == "__main__":
    # Small shapes consistent with the forward: batch=2, N=8 annot items, dim=32 features.
    B, N, D = 2, 8, 32

    key = jax.random.PRNGKey(0)
    kx, kv, kw, kb = jax.random.split(key, 4)

    x = jax.random.normal(kx, (B, N, D), dtype=jnp.float32)
    v = jax.random.normal(kv, (B, N, 1), dtype=jnp.float32)

    # Deterministic nn.Linear(dim, 1)-style init: U(-1/sqrt(D), 1/sqrt(D)).
    bound = 1.0 / (D ** 0.5)
    weight = jax.random.uniform(kw, (1, D), minval=-bound, maxval=bound,
                                dtype=jnp.float32)
    bias = jax.random.uniform(kb, (1,), minval=-bound, maxval=bound,
                              dtype=jnp.float32)

    result, out = full_expertise_forward(x, v, weight, bias)
    jax.block_until_ready((result, out))

    ref_result, ref_out = reference_forward(x, v, weight, bias)
    assert result.shape == (B, 1) and out.shape == (B, N, 1)
    assert jnp.allclose(result, ref_result, atol=1e-5, rtol=1e-5)
    assert jnp.allclose(out, ref_out, atol=1e-5, rtol=1e-5)

    print("KERNEL_OK")
</pallas_src>

<mosaic_0001>
module attributes {stable_mosaic.version = 11 : i64} {
  func.func @_expertise_kernel(%arg0: i32, %arg1: i32, %arg2: memref<2x8x32xf32, #tpu.memory_space<vmem>>, %arg3: memref<2x8xf32, #tpu.memory_space<vmem>>, %arg4: memref<1x32xf32, #tpu.memory_space<vmem>>, %arg5: memref<1xf32, #tpu.memory_space<smem>>, %arg6: memref<2x1xf32, #tpu.memory_space<vmem>>, %arg7: memref<2x8xf32, #tpu.memory_space<vmem>>, %arg8: memref<2x1xf32, #tpu.memory_space<vmem>>) attributes {dimension_semantics = [#tpu.dimension_semantics<parallel>, #tpu.dimension_semantics<arbitrary>], iteration_bounds = array<i64: 1, 1>, scalar_prefetch = 0 : i64, scratch_operands = 1 : i64, tpu.core_type = #tpu.core_type<tc>, window_params = [{transform_indices = @transform_0, window_bounds = array<i64: 2, 8, 32>}, {transform_indices = @transform_1, window_bounds = array<i64: 2, 8>}, {pipeline_mode = #tpu.pipeline_mode<synchronous>, transform_indices = @transform_2, window_bounds = array<i64: 1, 32>}, {transform_indices = @transform_3, window_bounds = array<i64: 1>}, {transform_indices = @transform_4, window_bounds = array<i64: 2, 1>}, {transform_indices = @transform_5, window_bounds = array<i64: 2, 8>}]} {
    %c0_i32 = arith.constant 0 : i32
    %0 = arith.cmpi eq, %arg1, %c0_i32 : i32
    %1 = arith.extui %0 : i1 to i32
    %c0_i32_0 = arith.constant 0 : i32
    %2 = arith.cmpi ne, %1, %c0_i32_0 : i32
    scf.if %2 {
      %cst_17 = arith.constant 0.000000e+00 : f32
      %23 = vector.broadcast %cst_17 : f32 to vector<2x1xf32>
      %c0_18 = arith.constant 0 : index
      %c0_19 = arith.constant 0 : index
      %24 = vector.load %arg8[%c0_18, %c0_19] : memref<2x1xf32, #tpu.memory_space<vmem>>, vector<2x1xf32>
      tpu.vector_store %arg8[%c0_18, %c0_19], %23 {strides = array<i32>} : memref<2x1xf32, #tpu.memory_space<vmem>>, vector<2x1xf32>,
    } else {
    }
    %c0 = arith.constant 0 : index
    %c0_1 = arith.constant 0 : index
    %c0_2 = arith.constant 0 : index
    %3 = vector.load %arg2[%c0, %c0_1, %c0_2] : memref<2x8x32xf32, #tpu.memory_space<vmem>>, vector<2x8x32xf32>
    %c0_3 = arith.constant 0 : index
    %c0_4 = arith.constant 0 : index
    %4 = vector.load %arg4[%c0_3, %c0_4] : memref<1x32xf32, #tpu.memory_space<vmem>>, vector<1x32xf32>
    %5 = vector.shape_cast %4 : vector<1x32xf32> to vector<1x1x32xf32>
    %c0_5 = arith.constant 0 : index
    %6 = memref.load %arg5[%c0_5] : memref<1xf32, #tpu.memory_space<smem>>
    %7 = vector.broadcast %5 : vector<1x1x32xf32> to vector<2x8x32xf32>
    %8 = arith.mulf %3, %7 : vector<2x8x32xf32>
    %cst = arith.constant dense<0.000000e+00> : vector<2x8xf32>
    %9 = vector.multi_reduction <add>, %8, %cst [2] : vector<2x8x32xf32> to vector<2x8xf32>
    %10 = vector.broadcast %6 : f32 to vector<2x8xf32>
    %11 = arith.addf %9, %10 : vector<2x8xf32>
    %c0_6 = arith.constant 0 : index
    %c0_7 = arith.constant 0 : index
    %12 = vector.load %arg7[%c0_6, %c0_7] : memref<2x8xf32, #tpu.memory_space<vmem>>, vector<2x8xf32>
    tpu.vector_store %arg7[%c0_6, %c0_7], %11 {strides = array<i32>} : memref<2x8xf32, #tpu.memory_space<vmem>>, vector<2x8xf32>,
    %c0_8 = arith.constant 0 : index
    %c0_9 = arith.constant 0 : index
    %13 = vector.load %arg3[%c0_8, %c0_9] : memref<2x8xf32, #tpu.memory_space<vmem>>, vector<2x8xf32>
    %14 = arith.mulf %11, %13 : vector<2x8xf32>
    %c0_10 = arith.constant 0 : index
    %c0_11 = arith.constant 0 : index
    %15 = vector.load %arg8[%c0_10, %c0_11] : memref<2x1xf32, #tpu.memory_space<vmem>>, vector<2x1xf32>
    %cst_12 = arith.constant dense<0.000000e+00> : vector<2xf32>
    %16 = vector.multi_reduction <add>, %14, %cst_12 [1] : vector<2x8xf32> to vector<2xf32>
    %17 = vector.shape_cast %16 : vector<2xf32> to vector<2x1xf32>
    %18 = arith.addf %15, %17 : vector<2x1xf32>
    %c0_13 = arith.constant 0 : index
    %c0_14 = arith.constant 0 : index
    %19 = vector.load %arg8[%c0_13, %c0_14] : memref<2x1xf32, #tpu.memory_space<vmem>>, vector<2x1xf32>
    tpu.vector_store %arg8[%c0_13, %c0_14], %18 {strides = array<i32>} : memref<2x1xf32, #tpu.memory_space<vmem>>, vector<2x1xf32>,
    %c0_i32_15 = arith.constant 0 : i32
    %20 = arith.cmpi eq, %arg1, %c0_i32_15 : i32
    %21 = arith.extui %20 : i1 to i32
    %c0_i32_16 = arith.constant 0 : i32
    %22 = arith.cmpi ne, %21, %c0_i32_16 : i32
    scf.if %22 {
      %c0_17 = arith.constant 0 : index
      %c0_18 = arith.constant 0 : index
      %23 = vector.load %arg8[%c0_17, %c0_18] : memref<2x1xf32, #tpu.memory_space<vmem>>, vector<2x1xf32>
      %c0_19 = arith.constant 0 : index
      %c0_20 = arith.constant 0 : index
      %24 = vector.load %arg6[%c0_19, %c0_20] : memref<2x1xf32, #tpu.memory_space<vmem>>, vector<2x1xf32>
      tpu.vector_store %arg6[%c0_19, %c0_20], %23 {strides = array<i32>} : memref<2x1xf32, #tpu.memory_space<vmem>>, vector<2x1xf32>,
    } else {
    }
    return
  }
  func.func @transform_0(%arg0: i32, %arg1: i32) -> (i32, i32, i32) {
    %c0_i32 = arith.constant 0 : i32
    %c0_i32_0 = arith.constant 0 : i32
    return %arg0, %arg1, %c0_i32 : i32, i32, i32
  }
  func.func @transform_1(%arg0: i32, %arg1: i32) -> (i32, i32) {
    %c0_i32 = arith.constant 0 : i32
    return %arg0, %arg1 : i32, i32
  }
  func.func @transform_2(%arg0: i32, %arg1: i32) -> (i32, i32) {
    %c0_i32 = arith.constant 0 : i32
    %c0_i32_0 = arith.constant 0 : i32
    %c0_i32_1 = arith.constant 0 : i32
    return %c0_i32, %c0_i32_0 : i32, i32
  }
  func.func @transform_3(%arg0: i32, %arg1: i32) -> i32 {
    %c0_i32 = arith.constant 0 : i32
    %c0_i32_0 = arith.constant 0 : i32
    return %c0_i32 : i32
  }
  func.func @transform_4(%arg0: i32, %arg1: i32) -> (i32, i32) {
    %c0_i32 = arith.constant 0 : i32
    %c0_i32_0 = arith.constant 0 : i32
    return %arg0, %c0_i32 : i32, i32
  }
  func.func @transform_5(%arg0: i32, %arg1: i32) -> (i32, i32) {
    %c0_i32 = arith.constant 0 : i32
    return %arg0, %arg1 : i32, i32
  }
}

</mosaic_0001>

<bundles_post_ra>
// kernel: tpu_custom_call.1
= control target key start
LH: loop header
LB: loop body
LE: loop exit
PB: predicated region body
PF: predicated region fallthrough
CT: control target
= control target key end

     0   :  { %12 = vsyncpa [#allocation5], 0  ;;  %s259_s0 = inlined_call_operand.hbm [shape: f32[2,8,32], index: 0, kind: input, shape index: {}]   ;;  %s260_s1 = inlined_call_operand.vmem [shape: f32[2,8], index: 1, kind: input, shape index: {}]   ;;  %s261_s2 = inlined_call_operand.vmem [shape: f32[1,32], index: 2, kind: input, shape index: {}]   ;;  %s262_s3 = inlined_call_operand.<no memory space> [shape: f32[1], index: 3, kind: input, shape index: {}]   ;;  %s263_s4 = inlined_call_operand.vmem [shape: f32[2,1], index: 4, kind: output, shape index: {0}]   ;;  %s264_s5 = inlined_call_operand.hbm [shape: f32[2,8], index: 5, kind: output, shape index: {1}]  }
   0x1   :  { %13 = vsyncpa [#allocation6], 0  ;;  %s202_s18 = smov [#allocation4]  }
   0x2   :  { %s19_s19 = sshll.u32 %s202_s18, 4  ;;  %s20_s19 = int_to_ptr.vmem [resolvable:$true] %s19_s19 }
   0x3   :  { %s166_s20 = scalar_lea.vmem %s20_s19, 256  ;;  %p171_p1 = scmp.lt.s32.totalorder %s20_s19, %s20_s19 }
   0x4   :  { %p167_p0 = scmp.ne.s32.totalorder %s20_s19, %s166_s20  ;;  %p172_p2 = scmp.lt.s32.totalorder %s166_s20, %s166_s20 }
   0x6   :  { %p173_p3 = por %p172_p2, %p171_p1 }
   0x8   :  { %p174_p4 = pnand %p173_p3, %p167_p0 }
   0xa   :  { %177 = shalt.err (!%p174_p4)
}
   0xb   :  { %s203_s21 = smov 128   ;;  %s204_s22 = smov 8  }
   0xc   :  { %25 = dma.hbm_to_vmem [thread:$0]  %s259_s0, 256, %s20_s19, [#allocation5], %s203_s21, %s203_s21, %s204_s22  }
   0xd   :  { %198 = dma.done.wait [#allocation5], 256  }
   0xe   :  { %199 = vsyncadd [#allocation5], 4294967040  ;;  %v65_v0 = vlaneseq  ;;  %v41_v5 = vld [vmem:[#allocation4] sm:$0xff]  ;;  %v149_v6 = vld [vmem:[%s261_s2] ss:$0 sm:$0xff]  ;;  %vm53_vm0 = vcmask 261120   ;;  %v60_v17 = vstv %s262_s3 }
   0xf   :  { %v42_v7 = vld [vmem:[#allocation4 + $0x8] sm:$0xff]  ;;  %v51_v9 = vmul.f32 %v149_v6, %v41_v5  ;;  %v80_v11 = vld [vmem:[%s260_s1] sm:$0x3]  ;;  %v205_v16 = vmov 0   ;;  %vm75_vm1 = vcmask 1041409   ;;  %vm78_vm2 = vcmask 58368  }
  0x10   :  { %v66_v1 = vand.u32 127, %v65_v0  ;;  %v68_v2 = vshrl.u32 %v65_v0, 7  ;;  %v52_v10 = vmul.f32 %v149_v6, %v42_v7  ;;  %156 = vset.pattern.permute.xlu0 %v205_v16  ;;  %157 = vset.pattern.permute.xlu1 %v205_v16  ;;  %vm39_vm3 = vcmask 1024   ;;  %s207_s1 = smov [#allocation7]  }
  0x11   :  { %v54_v13 = vsel %vm53_vm0, %v51_v9, 0.0  ;;  %v206_v29 = vmov 0.0   ;;  %s138_s3 = sshll.u32 %s207_s1, 4  ;;  %s139_s3 = int_to_ptr.vmem [resolvable:$true] %s138_s3 }
  0x12   :  { %v69_v3 = vsub.s32 %v66_v1, %v68_v2  ;;  %v84_v4 = vsub.s32 0, %v68_v2  ;;  %v91_v8 = vsub.s32 1, %v68_v2  ;;  %55 = vadd.xlane.f32.xlu0 %v54_v13  ;;  %v57_v15 = vsel %vm53_vm0, %v52_v10, 0.0  ;;  %40 = vst.msk [vmem:[#allocation2] sm:$0x3] %vm39_vm3, %v206_v29  ;;  %s178_s29 = scalar_lea.vmem %s139_s3, 32  ;;  %p183_p6 = scmp.lt.s32.totalorder %s139_s3, %s139_s3 }
  0x13   :  { %p179_p5 = scmp.ne.s32.totalorder %s139_s3, %s178_s29  ;;  %p184_p7 = scmp.lt.s32.totalorder %s178_s29, %s178_s29 }
  0x14   :  { %v85_v12 = vrot.slane %v80_v11, %v84_v4  ;;  %v92_v14 = vrot.slane %v80_v11, %v91_v8 }
  0x15   :  { %p185_p8 = por %p184_p7, %p183_p6 }
  0x16   :  { %87 = vbcast.lane.b32.xlu1 %v85_v12, 256  ;;  %58 = vadd.xlane.f32.xlu0 %v57_v15 }
  0x17   :  { %p186_p9 = pnand %p185_p8, %p179_p5 }
  0x1a   :  { %94 = vbcast.lane.b32.xlu1 %v92_v14, 256 }
  0x88   :  { %v88_v18 = vpop.permute.xlu1 %87 }
  0x8c   :  { %v95_v23 = vpop.permute.xlu1 %94 }
  0x9b   :  { %v56_v19 = vpop.xlane.xlu0 %55 }
  0x9c   :  { %v61_v20 = vadd.f32 %v60_v17, %v56_v19 }
  0x9e   :  { %v98_v21 = vmul.f32 %v88_v18, %v61_v20  ;;  %v70_v25 = vrot.slane %v61_v20, %v69_v3 }
  0x9f   :  { %v59_v22 = vpop.xlane.xlu0 %58 }
  0xa0   :  { %v62_v24 = vadd.f32 %v60_v17, %v59_v22  ;;  %104 = vperm.xlu0 %156, %v98_v21  }
  0xa2   :  { %v74_v26 = vrot.slane %v62_v24, %v69_v3  ;;  %v99_v27 = vmul.f32 %v95_v23, %v62_v24 }
  0xa4   :  { %107 = vperm.xlu1 %157, %v99_v27   ;;  %v76_v28 = vsel %vm75_vm1, %v74_v26, %v70_v25 }
  0xa5   :  { %79 = vst.msk [vmem:[#allocation7] sm:$0x3] %vm78_vm2, %v76_v28 }
 0x11b   :  { %v105_v30 = vpop.permute.xlu0 %104 }
 0x11c   :  { %v112_v32 = vrot.slane %v105_v30, %v69_v3 }
 0x11f   :  { %v108_v31 = vpop.permute.xlu1 %107 }
 0x120   :  { %v116_v33 = vrot.slane %v108_v31, %v69_v3 }
 0x122   :  { %v117_v34 = vsel %vm75_vm1, %v116_v33, %v112_v32 }
 0x123   :  { %v119_v35 = vsel %vm78_vm2, %v117_v34, 0.0 }
 0x124   :  { %120 = vadd.xlane.f32.xlu1 %v119_v35 }
 0x125   :  { %189 = shalt.err (!%p186_p9)
}
 0x126   :  { %141 = dma.vmem_to_hbm [thread:$0]  %s139_s3, 32, %s264_s5, [#allocation6]   ;;  %v100_v36 = vld [vmem:[#allocation2] sm:$0x3] }
 0x1ad   :  { %v121_v37 = vpop.xlane.xlu1 %120 }
 0x1ae   :  { %v122_v38 = vadd.f32 %v121_v37, %v100_v36 }
 0x1b0   :  { %124 = vst.msk [vmem:[#allocation2] sm:$0x3] %vm39_vm3, %v122_v38 }
 0x1b7   :  { %v128_v39 = vld [vmem:[#allocation2] sm:$0x3] }
 0x1b8   :  { %129 = vst.msk [vmem:[%s263_s4] sm:$0x3] %vm39_vm3, %v128_v39 }
 0x1b9   :  { %200 = dma.done.wait [#allocation6], 32  }
 0x1ba   :  { %201 = vsyncadd [#allocation6], 4294967264 }
 0x1bb   :  { %147 = vsyncpa [#allocation5], 1 }
 0x1bc   :  { %148 = vsyncpa [#allocation6], 1 }

</bundles_post_ra>
